<compile_context>
chip_gen: v6e
topology: v6e:2x2x1
jax: 0.10.0
libtpu: 0.0.40
codegen_flags: <defaults>
</compile_context>

<pallas_src>
import math

import jax
import jax.numpy as jnp
from jax import lax
from jax.experimental import pallas as pl
from jax.experimental.pallas import tpu as pltpu


# ----------------------------------------------------------------------------
# Init-time glue (matches the module's __init__ / compute_weight(True)):
# 200-step power iteration for domain = codomain = 2.
# ----------------------------------------------------------------------------
def _l2_normalize(x, eps=1e-12):
    n = jnp.sqrt(jnp.sum(x * x))
    return x / jnp.maximum(n, eps)


def _power_iteration(weight, u0, v0, n_iterations=200):
    def body(_, uv):
        u, v = uv
        u = _l2_normalize(weight @ v)
        v = _l2_normalize(weight.T @ u)
        return (u, v)
    return lax.fori_loop(0, n_iterations, body, (u0, v0))


# ----------------------------------------------------------------------------
# Scalar spectral-norm scale (compute once per weight update, then cache).
# ----------------------------------------------------------------------------
def compute_inv_factor(weight, u, v, coeff=0.97):
    """Returns 1 / max(1, sigma/coeff) with sigma = u^T (W v).

    Depends only on (weight, u, v, coeff), NOT on the activations, so compute it
    once per weight update and pass it to induced_norm_linear(inv_factor=...) to
    avoid re-reading W from HBM on every forward call.
    """
    wv = jnp.dot(weight, v.astype(weight.dtype),
                 preferred_element_type=jnp.float32)
    sigma = jnp.dot(u.astype(jnp.float32), wv)
    # NOTE: 1/max(1, sigma/coeff) (NOT min(1, coeff/sigma)) so that degenerate
    # sigma <= 0 clamps the factor to 1, exactly like the reference.
    return 1.0 / jnp.maximum(jnp.float32(1.0), sigma / jnp.float32(coeff))


# ----------------------------------------------------------------------------
# Pallas kernel: tiled GEMM, output-side scaling + bias.
# ----------------------------------------------------------------------------
def _induced_linear_kernel(scale_ref, x_ref, w_ref, b_ref, o_ref, acc_ref):
    """One (TM, TN) output tile, accumulated over the K grid axis.

    scale_ref : (1,)      SMEM scalar-prefetch ref holding inv_factor.
    x_ref     : (TM, TK)  tile of x.
    w_ref     : (TN, TK)  tile of W (stored (out, in); contraction over last dim).
    b_ref     : (1,  TN)  tile of bias (f32).
    o_ref     : (TM, TN)  output tile.
    acc_ref   : (TM, TN)  f32 VMEM accumulator.
    """
    k = pl.program_id(2)

    # Contract last (lane) dim of both operands -> MXU, f32 accumulation.
    partial = lax.dot_general(
        x_ref[...], w_ref[...],
        dimension_numbers=(((1,), (1,)), ((), ())),
        preferred_element_type=jnp.float32,
    )

    @pl.when(k == 0)
    def _():
        acc_ref[...] = partial          # first step: direct store (no zero-fill)

    @pl.when(k > 0)
    def _():
        acc_ref[...] += partial

    @pl.when(k == pl.num_programs(2) - 1)
    def _():
        y = acc_ref[...] * scale_ref[0] + b_ref[...]
        o_ref[...] = y.astype(o_ref.dtype)


# ----------------------------------------------------------------------------
# Wrapper.
# ----------------------------------------------------------------------------
def _round_up(x, m):
    return ((x + m - 1) // m) * m


def _cdiv(a, b):
    return (a + b - 1) // b


def _pick_tiles_and_vmem(itemsize):
    """Generation-aware default (tm, tn, tk) targets and scoped-VMEM limit."""
    tk = 512 if itemsize >= 4 else 1024          # bigger K tile for bf16
    try:
        kind = jax.devices()[0].device_kind.lower()
    except Exception:
        kind = ""
    try:
        vmem_cap = pltpu.get_tpu_info().vmem_capacity_bytes
    except Exception:
        vmem_cap = 64 << 20                      # conservative (v7x-sized)
    if "v5" in kind:
        # v5e: 4x128^2 MXU is already compute-bound at 512^2 output tiles, but
        # its scoped-VMEM default is only 16 MiB, so raise it explicitly.
        return 512, 512, tk, 48 << 20
    if vmem_cap >= (96 << 20):
        # v6e-class (128 MiB VMEM): big output tiles to clear the HBM roofline.
        return 1024, 1024, tk, 64 << 20
    # v7x-class (64 MiB VMEM per TC): 768^2 already exceeds the compute:BW ratio.
    return 768, 768, tk, 40 << 20


def induced_norm_linear(x, weight, u, v, bias=None, coeff=0.97, *,
                        inv_factor=None, tm=None, tn=None, tk=None):
    """Forward of InducedNormLinear: y = x @ (W / max(1, sigma/coeff))^T + bias.

    x: (..., in_f); weight: (out_f, in_f); u: (out_f,); v: (in_f,);
    bias: (out_f,) or None.  inv_factor: optional precomputed scalar
    1/max(1, sigma/coeff) (cache it per weight update; it does not depend on x).
    Returns (..., out_f) in x.dtype (f32 accumulation).
    """
    N, K = weight.shape
    *lead, K2 = x.shape
    assert K2 == K, "last dim of x must equal in_features"
    x2 = x.reshape(-1, K)
    M = x2.shape[0]

    if inv_factor is None:
        inv_factor = compute_inv_factor(weight, u, v, coeff)
    inv_factor = jnp.asarray(inv_factor, jnp.float32).reshape((1,))

    # Explicit dtype contract: GEMM runs in x.dtype with f32 accumulation.
    weight = weight.astype(x2.dtype)
    if bias is None:
        bias = jnp.zeros((N,), jnp.float32)
    bias2 = bias.astype(jnp.float32).reshape(1, N)

    # ---- tile selection ----------------------------------------------------
    tn_auto = tn is None
    dtm, dtn, dtk, vmem_limit = _pick_tiles_and_vmem(x2.dtype.itemsize)
    tm = dtm if tm is None else tm
    tn = dtn if tn is None else tn
    tk = dtk if tk is None else tk

    # Full-dim blocks are always legal; sub-dim blocks must be aligned.
    tm = min(tm, M)
    tn = min(tn, N)
    tk = min(tk, K)
    if tm < M:
        assert tm % 8 == 0, "tm must be a multiple of 8"
    if tn < N:
        assert tn % 128 == 0, "tn must be a multiple of 128"
    if tk < K:
        assert tk % 128 == 0, "tk must be a multiple of 128"

    # v7x megacore: if M has a single block, split N into >= 2 parallel blocks.
    if tn_auto and _cdiv(M, tm) == 1 and N > 128:
        tn = min(tn, _cdiv(_cdiv(N, 128), 2) * 128)

    # ---- K handling: prefer an aligned divisor of K over padding a copy ----
    Kp = K
    if tk < K and K % tk != 0:
        if K % 128 == 0:
            cand = tk
            while cand > 128 and K % cand != 0:
                cand -= 128
            tk = cand                      # divides K, no padding / no copy
        else:
            # TODO(synk): could mask the last K tile in-kernel instead of padding
            # (padding copies all of x and W once per call for ragged K).
            Kp = _round_up(K, tk)

    if Kp != K:
        x2 = jnp.pad(x2, ((0, 0), (0, Kp - K)))
        weight = jnp.pad(weight, ((0, 0), (0, Kp - K)))

    gm, gn, gk = _cdiv(M, tm), _cdiv(N, tn), _cdiv(Kp, tk)

    # Cost estimate accounting for re-reads (x read gn times, W read gm times).
    cost = pl.CostEstimate(
        flops=2 * M * N * Kp,
        transcendentals=0,
        bytes_accessed=int(gn * M * Kp * x2.dtype.itemsize
                           + gm * N * Kp * weight.dtype.itemsize
                           + gm * N * 4
                           + M * N * x.dtype.itemsize),
    )

    out = pl.pallas_call(
        _induced_linear_kernel,
        out_shape=jax.ShapeDtypeStruct((M, N), x.dtype),
        grid_spec=pltpu.PrefetchScalarGridSpec(
            num_scalar_prefetch=1,
            grid=(gm, gn, gk),
            in_specs=[
                pl.BlockSpec((tm, tk), lambda i, j, k, s: (i, k)),   # x
                pl.BlockSpec((tn, tk), lambda i, j, k, s: (j, k)),   # W (out, in)
                pl.BlockSpec((1, tn), lambda i, j, k, s: (0, j)),    # bias (f32)
            ],
            out_specs=pl.BlockSpec((tm, tn), lambda i, j, k, s: (i, j)),
            scratch_shapes=[pltpu.VMEM((tm, tn), jnp.float32)],
        ),
        compiler_params=pltpu.CompilerParams(
            dimension_semantics=("parallel", "parallel", "arbitrary"),
            vmem_limit_bytes=vmem_limit),
        cost_estimate=cost,
    )(inv_factor, x2, weight, bias2)

    return out.reshape(*lead, N)


# ----------------------------------------------------------------------------
# Pure-JAX reference.
# ----------------------------------------------------------------------------
def _reference(x, weight, u, v, bias, coeff=0.97):
    sigma = jnp.dot(u, weight @ v)
    factor = jnp.maximum(1.0, sigma / coeff)
    w = weight / factor
    return x @ w.T + bias[None, :]


if __name__ == "__main__":
    coeff = 0.97

    def make_params(key, in_f, out_f):
        k_w, k_b, k_u, k_v = jax.random.split(key, 4)
        # kaiming_uniform_(a=sqrt(5)) -> Uniform(-1/sqrt(fan_in), 1/sqrt(fan_in))
        bound = 1.0 / math.sqrt(in_f)
        weight = jax.random.uniform(k_w, (out_f, in_f), jnp.float32, -bound, bound)
        bias = jax.random.uniform(k_b, (out_f,), jnp.float32, -bound, bound)
        # u, v buffers: normal init, l2-normalize (domain=codomain=2), then the
        # module's 200 power-iteration steps from __init__ / compute_weight(True).
        # TODO(synk): the adaptive atol/rtol early-stopping branch and non-2
        # domain/codomain normalizations (projmax_, Lp) are init-time-only; not ported.
        u0 = _l2_normalize(jax.random.normal(k_u, (out_f,), jnp.float32))
        v0 = _l2_normalize(jax.random.normal(k_v, (in_f,), jnp.float32))
        u, v = _power_iteration(weight, u0, v0, n_iterations=200)
        return weight, bias, u, v

    key = jax.random.PRNGKey(0)
    k1, k2, kx1, kx2 = jax.random.split(key, 4)

    # --- case 1: module-typical tiny shape (single-tile path) ---------------
    w1, b1, u1, v1 = make_params(k1, 32, 16)
    x1 = jax.random.normal(kx1, (8, 32), jnp.float32)
    inv1 = compute_inv_factor(w1, u1, v1, coeff)       # cached once per weight update
    y1 = jax.block_until_ready(
        induced_norm_linear(x1, w1, u1, v1, b1, coeff, inv_factor=inv1))
    r1 = _reference(x1, w1, u1, v1, b1, coeff)
    assert y1.shape == r1.shape == (8, 16)
    assert jnp.allclose(y1, r1, atol=1e-5, rtol=1e-5), "case 1 mismatch vs reference"

    # --- case 2: non-multiple shapes, K accumulation + edge masking ---------
    w2, b2, u2, v2 = make_params(k2, 300, 200)
    x2 = jax.random.normal(kx2, (192, 300), jnp.float32)
    y2 = jax.block_until_ready(
        induced_norm_linear(x2, w2, u2, v2, b2, coeff, tm=64, tn=128, tk=128))
    r2 = _reference(x2, w2, u2, v2, b2, coeff)
    assert y2.shape == r2.shape == (192, 200)
    assert jnp.allclose(y2, r2, atol=1e-4, rtol=1e-4), "case 2 mismatch vs reference"

    print("KERNEL_OK")
</pallas_src>

<mosaic_0001>
module attributes {stable_mosaic.version = 11 : i64} {
  func.func @_induced_linear_kernel(%arg0: i32, %arg1: i32, %arg2: i32, %arg3: memref<1xf32, #tpu.memory_space<smem>>, %arg4: memref<8x32xf32, #tpu.memory_space<vmem>>, %arg5: memref<16x32xf32, #tpu.memory_space<vmem>>, %arg6: memref<1x16xf32, #tpu.memory_space<vmem>>, %arg7: memref<8x16xf32, #tpu.memory_space<vmem>>, %arg8: memref<8x16xf32, #tpu.memory_space<vmem>>) attributes {dimension_semantics = [#tpu.dimension_semantics<parallel>, #tpu.dimension_semantics<parallel>, #tpu.dimension_semantics<arbitrary>], iteration_bounds = array<i64: 1, 1, 1>, scalar_prefetch = 1 : i64, scratch_operands = 1 : i64, tpu.core_type = #tpu.core_type<tc>, window_params = [{transform_indices = @transform_0, window_bounds = array<i64: 8, 32>}, {transform_indices = @transform_1, window_bounds = array<i64: 16, 32>}, {transform_indices = @transform_2, window_bounds = array<i64: 1, 16>}, {transform_indices = @transform_3, window_bounds = array<i64: 8, 16>}]} {
    %c0 = arith.constant 0 : index
    %c0_0 = arith.constant 0 : index
    %0 = vector.load %arg4[%c0, %c0_0] : memref<8x32xf32, #tpu.memory_space<vmem>>, vector<8x32xf32>
    %c0_1 = arith.constant 0 : index
    %c0_2 = arith.constant 0 : index
    %1 = vector.load %arg5[%c0_1, %c0_2] : memref<16x32xf32, #tpu.memory_space<vmem>>, vector<16x32xf32>
    %cst = arith.constant dense<0.000000e+00> : vector<8x16xf32>
    %2 = tpu.matmul %0, %1, %cst {dimension_numbers = #tpu.dot_dimension_numbers<[1], [1], [0], [0], [0, 0, 1, 0], [], []>} : vector<8x32xf32>, vector<16x32xf32>, vector<8x16xf32> -> vector<8x16xf32>
    %c0_i32 = arith.constant 0 : i32
    %3 = arith.cmpi eq, %arg2, %c0_i32 : i32
    %4 = arith.extui %3 : i1 to i32
    %c0_i32_3 = arith.constant 0 : i32
    %5 = arith.cmpi ne, %4, %c0_i32_3 : i32
    scf.if %5 {
      %c0_8 = arith.constant 0 : index
      %c0_9 = arith.constant 0 : index
      %12 = vector.load %arg8[%c0_8, %c0_9] : memref<8x16xf32, #tpu.memory_space<vmem>>, vector<8x16xf32>
      tpu.vector_store %arg8[%c0_8, %c0_9], %2 {strides = array<i32>} : memref<8x16xf32, #tpu.memory_space<vmem>>, vector<8x16xf32>,
    } else {
    }
    %c0_i32_4 = arith.constant 0 : i32
    %6 = arith.cmpi sgt, %arg2, %c0_i32_4 : i32
    %7 = arith.extui %6 : i1 to i32
    %c0_i32_5 = arith.constant 0 : i32
    %8 = arith.cmpi ne, %7, %c0_i32_5 : i32
    scf.if %8 {
      %c0_8 = arith.constant 0 : index
      %c0_9 = arith.constant 0 : index
      %12 = vector.load %arg8[%c0_8, %c0_9] : memref<8x16xf32, #tpu.memory_space<vmem>>, vector<8x16xf32>
      %13 = arith.addf %12, %2 : vector<8x16xf32>
      %c0_10 = arith.constant 0 : index
      %c0_11 = arith.constant 0 : index
      %14 = vector.load %arg8[%c0_10, %c0_11] : memref<8x16xf32, #tpu.memory_space<vmem>>, vector<8x16xf32>
      tpu.vector_store %arg8[%c0_10, %c0_11], %13 {strides = array<i32>} : memref<8x16xf32, #tpu.memory_space<vmem>>, vector<8x16xf32>,
    } else {
    }
    %c0_i32_6 = arith.constant 0 : i32
    %9 = arith.cmpi eq, %arg2, %c0_i32_6 : i32
    %10 = arith.extui %9 : i1 to i32
    %c0_i32_7 = arith.constant 0 : i32
    %11 = arith.cmpi ne, %10, %c0_i32_7 : i32
    scf.if %11 {
      %c0_8 = arith.constant 0 : index
      %c0_9 = arith.constant 0 : index
      %12 = vector.load %arg8[%c0_8, %c0_9] : memref<8x16xf32, #tpu.memory_space<vmem>>, vector<8x16xf32>
      %c0_10 = arith.constant 0 : index
      %13 = memref.load %arg3[%c0_10] : memref<1xf32, #tpu.memory_space<smem>>
      %14 = vector.broadcast %13 : f32 to vector<8x16xf32>
      %15 = arith.mulf %12, %14 : vector<8x16xf32>
      %c0_11 = arith.constant 0 : index
      %c0_12 = arith.constant 0 : index
      %16 = vector.load %arg6[%c0_11, %c0_12] : memref<1x16xf32, #tpu.memory_space<vmem>>, vector<1x16xf32>
      %17 = vector.broadcast %16 : vector<1x16xf32> to vector<8x16xf32>
      %18 = arith.addf %15, %17 : vector<8x16xf32>
      %c0_13 = arith.constant 0 : index
      %c0_14 = arith.constant 0 : index
      %19 = vector.load %arg7[%c0_13, %c0_14] : memref<8x16xf32, #tpu.memory_space<vmem>>, vector<8x16xf32>
      tpu.vector_store %arg7[%c0_13, %c0_14], %18 {strides = array<i32>} : memref<8x16xf32, #tpu.memory_space<vmem>>, vector<8x16xf32>,
    } else {
    }
    return
  }
  func.func @transform_0(%arg0: i32, %arg1: i32, %arg2: i32, %arg3: memref<1xf32, #tpu.memory_space<smem>>) -> (i32, i32) {
    %c0_i32 = arith.constant 0 : i32
    return %arg0, %arg2 : i32, i32
  }
  func.func @transform_1(%arg0: i32, %arg1: i32, %arg2: i32, %arg3: memref<1xf32, #tpu.memory_space<smem>>) -> (i32, i32) {
    %c0_i32 = arith.constant 0 : i32
    return %arg1, %arg2 : i32, i32
  }
  func.func @transform_2(%arg0: i32, %arg1: i32, %arg2: i32, %arg3: memref<1xf32, #tpu.memory_space<smem>>) -> (i32, i32) {
    %c0_i32 = arith.constant 0 : i32
    %c0_i32_0 = arith.constant 0 : i32
    return %c0_i32, %arg1 : i32, i32
  }
  func.func @transform_3(%arg0: i32, %arg1: i32, %arg2: i32, %arg3: memref<1xf32, #tpu.memory_space<smem>>) -> (i32, i32) {
    %c0_i32 = arith.constant 0 : i32
    return %arg0, %arg1 : i32, i32
  }
}

</mosaic_0001>

<bundles_post_ra>
// kernel: tpu_custom_call.1
= control target key start
LH: loop header
LB: loop body
LE: loop exit
PB: predicated region body
PF: predicated region fallthrough
CT: control target
= control target key end

     0   :  { %10 = vsyncpa [#allocation6], 0  ;;  %s307_s0 = inlined_call_operand.<no memory space> [shape: f32[1], index: 0, kind: input, shape index: {}]   ;;  %s308_s1 = inlined_call_operand.hbm [shape: f32[8,32], index: 1, kind: input, shape index: {}]   ;;  %s309_s2 = inlined_call_operand.hbm [shape: f32[16,32], index: 2, kind: input, shape index: {}]   ;;  %s310_s3 = inlined_call_operand.vmem [shape: f32[1,16], index: 3, kind: input, shape index: {}]   ;;  %s311_s4 = inlined_call_operand.hbm [shape: f32[8,16], index: 4, kind: output, shape index: {}]  }
   0x1   :  { %11 = vsyncpa [#allocation9], 0 }
   0x2   :  { %12 = vsyncpa [#allocation7], 0  ;;  %s260_s15 = smov [#allocation5]   ;;  %s261_s17 = smov [#allocation8]  }
   0x3   :  { %s19_s16 = sshll.u32 %s260_s15, 4  ;;  %s28_s18 = sshll.u32 %s261_s17, 4  ;;  %s20_s16 = int_to_ptr.vmem [resolvable:$true] %s19_s16  ;;  %s29_s18 = int_to_ptr.vmem [resolvable:$true] %s28_s18 }
   0x4   :  { %s202_s19 = scalar_lea.vmem %s20_s16, 128  ;;  %p207_p1 = scmp.lt.s32.totalorder %s20_s16, %s20_s16 }
   0x5   :  { %p203_p0 = scmp.ne.s32.totalorder %s20_s16, %s202_s19  ;;  %p208_p2 = scmp.lt.s32.totalorder %s202_s19, %s202_s19 }
   0x7   :  { %p209_p3 = por %p208_p2, %p207_p1 }
   0x9   :  { %p210_p4 = pnand %p209_p3, %p203_p0 }
   0xb   :  { %213 = shalt.err (!%p210_p4)
}
   0xc   :  { %22 = dma.hbm_to_vmem [thread:$0]  %s308_s1, 128, %s20_s16, [#allocation6]  }
   0xd   :  { %s222_s22 = scalar_lea.vmem %s29_s18, 256  ;;  %p227_p6 = scmp.lt.s32.totalorder %s29_s18, %s29_s18 }
   0xe   :  { %p223_p5 = scmp.ne.s32.totalorder %s29_s18, %s222_s22  ;;  %p228_p7 = scmp.lt.s32.totalorder %s222_s22, %s222_s22 }
  0x10   :  { %p229_p8 = por %p228_p7, %p227_p6 }
  0x12   :  { %p230_p9 = pnand %p229_p8, %p223_p5 }
  0x14   :  { %233 = shalt.err (!%p230_p9)
}
  0x15   :  { %s262_s23 = smov 128   ;;  %s263_s24 = smov 8  }
  0x16   :  { %34 = dma.hbm_to_vmem [thread:$0]  %s309_s2, 256, %s29_s18, [#allocation9], %s262_s23, %s262_s23, %s263_s24  }
  0x17   :  { %254 = dma.done.wait [#allocation6], 128  }
  0x18   :  { %255 = vsyncadd [#allocation6], 4294967168 }
  0x19   :  { %256 = dma.done.wait [#allocation9], 256  }
  0x1a   :  { %257 = vsyncadd [#allocation9], 4294967040  ;;  %v264_v0 = vmov 0.0   ;;  %vm265_vm0 = vmmov 0   ;;  %vm46_vm1 = vcmask 261120   ;;  %v45_v1 = vld [vmem:[#allocation8 + $0x8] sm:$0xff]  ;;  %v145_v6 = vstv %s307_s0 }
  0x1b   :  { %180 = vmatprep.subr.mxu0 %v264_v0  ;;  %184 = vmatprep.mubr.msk.f32.mxu0 %vm265_vm0, %v264_v0  ;;  %v44_v2 = vld [vmem:[#allocation8] sm:$0xff]  ;;  %v43_v3 = vld [vmem:[#allocation5] sm:$0xff]  ;;  %vm130_vm2 = vcmask 130048   ;;  %v176_v8 = vld [vmem:[%s310_s3] ss:$0 sm:$0xff]  ;;  %s266_s29 = smov [#allocation10]  }
  0x1c   :  { %181 = vmatpush3.xpose.msk.msra.mxu0 %vm46_vm1, %v45_v1  ;;  %s163_s30 = sshll.u32 %s266_s29, 4  ;;  %s164_s30 = int_to_ptr.vmem [resolvable:$true] %s163_s30 }
  0x1d   :  { %182 = vmatprep.subr.mxu0 %v264_v0  ;;  %s234_s5 = scalar_lea.vmem %s164_s30, 128  ;;  %p239_p11 = scmp.lt.s32.totalorder %s164_s30, %s164_s30 }
  0x1e   :  { %p235_p10 = scmp.ne.s32.totalorder %s164_s30, %s234_s5  ;;  %p240_p12 = scmp.lt.s32.totalorder %s234_s5, %s234_s5 }
  0x20   :  { %183 = vmatpush3.xpose.msk.msra.mxu0 %vm46_vm1, %v44_v2  ;;  %p241_p13 = por %p240_p12, %p239_p11 }
  0x22   :  { %p242_p0 = pnand %p241_p13, %p235_p10 }
  0x23   :  { %185 = vmatmul.mubr.msk.f32.vlgmr.msra.gmra.mxu0 %vm46_vm1, %v43_v3 }
  0xe3   :  { %v122_v4 = vpop.f32.mrf.mxu0 }
  0xe4   :  { %131 = vst.msk [vmem:[#allocation2] sm:$0xff] %vm130_vm2, %v122_v4 }
  0xe5   :  { %v186_v5 = vpop.f32.mrf.mxu0 }
  0xeb   :  { %v143_v7 = vld [vmem:[#allocation2] sm:$0xff] }
  0xec   :  { %v146_v9 = vmul.f32 %v145_v6, %v143_v7 }
  0xee   :  { %v154_v10 = vadd.f32 %v176_v8, %v146_v9 }
  0xf0   :  { %156 = vst.msk [vmem:[#allocation10] sm:$0xff] %vm130_vm2, %v154_v10 }
  0xf1   :  { %245 = shalt.err (!%p242_p0)
}
  0xf2   :  { %166 = dma.vmem_to_hbm [thread:$0]  %s164_s30, 128, %s311_s4, [#allocation7]  }
  0xf3   :  { %258 = dma.done.wait [#allocation7], 128  }
  0xf4   :  { %259 = vsyncadd [#allocation7], 4294967168 }
  0xf5   :  { %170 = vsyncpa [#allocation6], 1 }
  0xf6   :  { %171 = vsyncpa [#allocation9], 1 }
  0xf7   :  { %172 = vsyncpa [#allocation7], 1 }

</bundles_post_ra>
